<compile_context>
chip_gen: v7x
topology: tpu7x:2x2x1
jax: 0.10.0
libtpu: 0.0.40
codegen_flags: <defaults>
</compile_context>

<pallas_src>
from functools import partial

import jax
import jax.numpy as jnp
from jax import lax
from jax.experimental import pallas as pl
from jax.experimental.pallas import tpu as pltpu

NLAYER = 3
DIM_LIST = [32, 64, 48, 16]   # dim_list[i] -> dim_list[i+1]
BN_EPS = 1e-5
TILE_B_MAX = 8192             # per-step batch columns (lanes); ~1 MiB x-tile


def _pick_tile_b(batch: int) -> int:
    """Multiple of 128, capped at TILE_B_MAX, aiming for >=4 grid steps
    (so v7x can shard the 'parallel' batch axis across both TensorCores)."""
    t = -(-batch // 4)                    # cdiv(batch, 4)
    t = ((t + 127) // 128) * 128          # round up to lane multiple
    return max(128, min(TILE_B_MAX, t))


def netblock_kernel(x_ref, *refs):
    """Fused forward pass on one batch tile.

    refs = (w0, s0, w1, s1, w2, s2, alpha, out)
      x_ref : [TILE_B, F_in]  f32   (PyTorch layout; cast to bf16 in-kernel)
      w_i   : [F_out, F_in]   bf16  (BN scale folded in)
      s_i   : [F_out, 1]      f32   (bias + BN shift folded)
      alpha : [1, 1]          f32   (PReLU slope)
      out   : [F_out_last, TILE_B]  (lane-dense: batch on lanes)
    """
    alpha_ref = refs[-2]
    out_ref = refs[-1]
    layer_refs = refs[:-2]

    # TODO(synk): eval-mode only — dropout layers are identity and BatchNorm
    # uses running statistics (folded into W/shift); training mode (stochastic
    # dropout, batch statistics) is not implemented.
    h = x_ref[...].astype(jnp.bfloat16)                 # [TILE_B, F_in]
    for i in range(NLAYER):
        w_ref, s_ref = layer_refs[2 * i], layer_refs[2 * i + 1]
        if i == 0:
            # Contract x's feature (lane) axis directly:
            #   z[o, b] = sum_k W'[o, k] * x[b, k]
            # so batch lands on the 128-lane axis -> lane-dense for the rest
            # of the chain and for the output store.
            z = lax.dot_general(
                w_ref[...], h,
                dimension_numbers=(((1,), (1,)), ((), ())),
                preferred_element_type=jnp.float32)      # [d_out, TILE_B]
        else:
            z = jnp.dot(w_ref[...], h,
                        preferred_element_type=jnp.float32)
        # Linear + BatchNorm (folded): z = (scale*W) @ x + (scale*b + shift)
        z = z + s_ref[...]                               # [d_out, 1] broadcast
        if i < NLAYER - 1:
            # act_list[i] = ReLU; Dropout is identity in eval mode.
            h = jnp.maximum(z, 0.0).astype(jnp.bfloat16)
        else:
            # act_list[-1] = Identity, then final PReLU (single shared alpha).
            h = jnp.where(z >= 0.0, z, z * alpha_ref[...])
    out_ref[...] = h.astype(out_ref.dtype)


@partial(jax.jit, static_argnames=("out_dtype",))
def netblock_forward(x, folded_params, alpha, *, out_dtype=jnp.bfloat16):
    """x: [B, DIM_LIST[0]] f32 (PyTorch layout, consumed as-is — no wrapper
    transpose/pad/cast).
    folded_params: list of (W_fold [dout, din] bf16, shift_fold [dout, 1] f32).
    alpha: [1, 1] f32.
    Returns the lane-dense [DIM_LIST[-1], B] result (transpose only if a
    [B, F_out] layout is really required downstream)."""
    batch = x.shape[0]
    tile_b = _pick_tile_b(batch)
    nb = pl.cdiv(batch, tile_b)          # ragged last tile handled by masking

    flat, in_specs = [], []
    # x: tiled along the batch axis, untransposed [B, F_in] layout.
    in_specs.append(pl.BlockSpec((tile_b, DIM_LIST[0]), lambda i: (i, 0)))
    # Folded weights/shifts: constant index_map -> stay VMEM-resident.
    for (w, s) in folded_params:
        flat += [w, s]
        in_specs.append(pl.BlockSpec(w.shape, lambda i: (0, 0)))
        in_specs.append(pl.BlockSpec(s.shape, lambda i: (0, 0)))
    # PReLU alpha as a tiny resident VMEM block (broadcast in-kernel).
    flat.append(alpha)
    in_specs.append(pl.BlockSpec((1, 1), lambda i: (0, 0)))

    out = pl.pallas_call(
        netblock_kernel,
        out_shape=jax.ShapeDtypeStruct((DIM_LIST[-1], batch), out_dtype),
        grid=(nb,),
        in_specs=in_specs,
        out_specs=pl.BlockSpec((DIM_LIST[-1], tile_b), lambda i: (0, i)),
        compiler_params=pltpu.CompilerParams(
            dimension_semantics=("parallel",),       # megacore sharding (v7x)
            vmem_limit_bytes=32 * 1024 * 1024),      # headroom for big tiles
    )(x, *flat)

    return out                                       # lane-dense [F_out, B]


def make_params(key):
    """Raw parameters mirroring the PyTorch module's __init__ (PyTorch layout)."""
    params = []
    for i in range(NLAYER):
        din, dout = DIM_LIST[i], DIM_LIST[i + 1]
        key, kw, kb = jax.random.split(key, 3)
        # initialize_weights overrides xavier with normal(0, 0.05) for Linear
        # weights; Linear bias keeps PyTorch default U(-1/sqrt(din), 1/sqrt(din)).
        w = 0.05 * jax.random.normal(kw, (dout, din), dtype=jnp.float32)
        bound = 1.0 / jnp.sqrt(jnp.float32(din))
        b = jax.random.uniform(kb, (dout,), minval=-bound, maxval=bound,
                               dtype=jnp.float32)
        # Fresh BatchNorm1d: gamma=1, beta=0, running_mean=0, running_var=1.
        gamma = jnp.ones((dout,), jnp.float32)
        beta = jnp.zeros((dout,), jnp.float32)
        running_mean = jnp.zeros((dout,), jnp.float32)
        running_var = jnp.ones((dout,), jnp.float32)
        params.append((w, b, gamma, beta, running_mean, running_var))
    alpha = jnp.array([[0.25]], dtype=jnp.float32)      # nn.PReLU() default
    return params, alpha


def fold_params(raw_params):
    """Fold bias + BatchNorm (eval) into the weights; cast weights to bf16."""
    folded = []
    for (w, b, gamma, beta, rm, rv) in raw_params:
        scale = gamma / jnp.sqrt(rv + BN_EPS)           # [dout]
        shift = beta - rm * scale                       # [dout]
        w_fold = (w * scale[:, None]).astype(jnp.bfloat16)          # [dout,din]
        shift_fold = (b * scale + shift).reshape(-1, 1).astype(jnp.float32)
        folded.append((w_fold, shift_fold))
    return folded


def reference_forward(x, raw_params, alpha):
    """Pure f32 reference matching the PyTorch eval-mode forward."""
    h = x
    for i, (w, b, gamma, beta, rm, rv) in enumerate(raw_params):
        z = h @ w.T + b
        z = (z - rm) / jnp.sqrt(rv + BN_EPS) * gamma + beta
        if i < NLAYER - 1:
            h = jnp.maximum(z, 0.0)
        else:
            h = jnp.where(z >= 0.0, z, alpha[0, 0] * z)
    return h


if __name__ == "__main__":
    key = jax.random.PRNGKey(0)
    key, kx = jax.random.split(key)
    batch = 300   # non-multiple of the 128-aligned tile: exercises the ragged
                  # last grid step (masked loads/stores) and a 3-step grid.
    x = jax.random.normal(kx, (batch, DIM_LIST[0]), dtype=jnp.float32)

    raw_params, alpha = make_params(key)
    folded = fold_params(raw_params)

    out = netblock_forward(x, folded, alpha)            # [F_out, B] bf16
    out = jax.block_until_ready(out)

    ref = reference_forward(x, raw_params, alpha)       # [B, F_out] f32
    assert out.shape == (DIM_LIST[-1], batch)
    # Transpose only in the test harness to compare against the PyTorch-layout
    # reference; bf16 MXU + bf16 output -> loosened tolerance.
    out_bt = out.T.astype(jnp.float32)
    assert jnp.allclose(out_bt, ref, atol=2e-2, rtol=2e-2), \
        float(jnp.max(jnp.abs(out_bt - ref)))
    print("KERNEL_OK")
</pallas_src>

<mosaic_0001>
module attributes {stable_mosaic.version = 11 : i64} {
  func.func @netblock_kernel(%arg0: i32, %arg1: memref<128x32xf32, #tpu.memory_space<vmem>>, %arg2: memref<64x32xbf16, #tpu.memory_space<vmem>>, %arg3: memref<64x1xf32, #tpu.memory_space<vmem>>, %arg4: memref<48x64xbf16, #tpu.memory_space<vmem>>, %arg5: memref<48x1xf32, #tpu.memory_space<vmem>>, %arg6: memref<16x48xbf16, #tpu.memory_space<vmem>>, %arg7: memref<16x1xf32, #tpu.memory_space<vmem>>, %arg8: memref<1x1xf32, #tpu.memory_space<vmem>>, %arg9: memref<16x128xbf16, #tpu.memory_space<vmem>>) attributes {dimension_semantics = [#tpu.dimension_semantics<parallel>], iteration_bounds = array<i64: 3>, scalar_prefetch = 0 : i64, scratch_operands = 0 : i64, tpu.core_type = #tpu.core_type<tc>, window_params = [{transform_indices = @transform_0, window_bounds = array<i64: 128, 32>}, {pipeline_mode = #tpu.pipeline_mode<synchronous>, transform_indices = @transform_1, window_bounds = array<i64: 64, 32>}, {pipeline_mode = #tpu.pipeline_mode<synchronous>, transform_indices = @transform_2, window_bounds = array<i64: 64, 1>}, {pipeline_mode = #tpu.pipeline_mode<synchronous>, transform_indices = @transform_3, window_bounds = array<i64: 48, 64>}, {pipeline_mode = #tpu.pipeline_mode<synchronous>, transform_indices = @transform_4, window_bounds = array<i64: 48, 1>}, {pipeline_mode = #tpu.pipeline_mode<synchronous>, transform_indices = @transform_5, window_bounds = array<i64: 16, 48>}, {pipeline_mode = #tpu.pipeline_mode<synchronous>, transform_indices = @transform_6, window_bounds = array<i64: 16, 1>}, {pipeline_mode = #tpu.pipeline_mode<synchronous>, transform_indices = @transform_7, window_bounds = array<i64: 1, 1>}, {transform_indices = @transform_8, window_bounds = array<i64: 16, 128>}]} {
    %c0 = arith.constant 0 : index
    %c0_0 = arith.constant 0 : index
    %0 = vector.load %arg1[%c0, %c0_0] : memref<128x32xf32, #tpu.memory_space<vmem>>, vector<128x32xf32>
    %1 = arith.truncf %0 : vector<128x32xf32> to vector<128x32xbf16>
    %c0_1 = arith.constant 0 : index
    %c0_2 = arith.constant 0 : index
    %2 = vector.load %arg2[%c0_1, %c0_2] : memref<64x32xbf16, #tpu.memory_space<vmem>>, vector<64x32xbf16>
    %cst = arith.constant dense<0.000000e+00> : vector<64x128xf32>
    %3 = tpu.matmul %2, %1, %cst {dimension_numbers = #tpu.dot_dimension_numbers<[1], [1], [0], [0], [0, 0, 1, 0], [], []>} : vector<64x32xbf16>, vector<128x32xbf16>, vector<64x128xf32> -> vector<64x128xf32>
    %c0_3 = arith.constant 0 : index
    %c0_4 = arith.constant 0 : index
    %4 = vector.load %arg3[%c0_3, %c0_4] : memref<64x1xf32, #tpu.memory_space<vmem>>, vector<64x1xf32>
    %5 = vector.broadcast %4 : vector<64x1xf32> to vector<64x128xf32>
    %6 = arith.addf %3, %5 : vector<64x128xf32>
    %cst_5 = arith.constant 0.000000e+00 : f32
    %7 = vector.broadcast %cst_5 : f32 to vector<64x128xf32>
    %8 = arith.maximumf %6, %7 : vector<64x128xf32>
    %9 = arith.truncf %8 : vector<64x128xf32> to vector<64x128xbf16>
    %c0_6 = arith.constant 0 : index
    %c0_7 = arith.constant 0 : index
    %10 = vector.load %arg4[%c0_6, %c0_7] : memref<48x64xbf16, #tpu.memory_space<vmem>>, vector<48x64xbf16>
    %cst_8 = arith.constant dense<0.000000e+00> : vector<48x128xf32>
    %11 = tpu.matmul %10, %9, %cst_8 {dimension_numbers = #tpu.dot_dimension_numbers<[1], [0], [0], [1], [0, 0, 1, 1], [], []>} : vector<48x64xbf16>, vector<64x128xbf16>, vector<48x128xf32> -> vector<48x128xf32>
    %c0_9 = arith.constant 0 : index
    %c0_10 = arith.constant 0 : index
    %12 = vector.load %arg5[%c0_9, %c0_10] : memref<48x1xf32, #tpu.memory_space<vmem>>, vector<48x1xf32>
    %13 = vector.broadcast %12 : vector<48x1xf32> to vector<48x128xf32>
    %14 = arith.addf %11, %13 : vector<48x128xf32>
    %cst_11 = arith.constant 0.000000e+00 : f32
    %15 = vector.broadcast %cst_11 : f32 to vector<48x128xf32>
    %16 = arith.maximumf %14, %15 : vector<48x128xf32>
    %17 = arith.truncf %16 : vector<48x128xf32> to vector<48x128xbf16>
    %c0_12 = arith.constant 0 : index
    %c0_13 = arith.constant 0 : index
    %18 = vector.load %arg6[%c0_12, %c0_13] : memref<16x48xbf16, #tpu.memory_space<vmem>>, vector<16x48xbf16>
    %cst_14 = arith.constant dense<0.000000e+00> : vector<16x128xf32>
    %19 = tpu.matmul %18, %17, %cst_14 {dimension_numbers = #tpu.dot_dimension_numbers<[1], [0], [0], [1], [0, 0, 1, 1], [], []>} : vector<16x48xbf16>, vector<48x128xbf16>, vector<16x128xf32> -> vector<16x128xf32>
    %c0_15 = arith.constant 0 : index
    %c0_16 = arith.constant 0 : index
    %20 = vector.load %arg7[%c0_15, %c0_16] : memref<16x1xf32, #tpu.memory_space<vmem>>, vector<16x1xf32>
    %21 = vector.broadcast %20 : vector<16x1xf32> to vector<16x128xf32>
    %22 = arith.addf %19, %21 : vector<16x128xf32>
    %cst_17 = arith.constant 0.000000e+00 : f32
    %23 = vector.broadcast %cst_17 : f32 to vector<16x128xf32>
    %24 = arith.cmpf oge, %22, %23 : vector<16x128xf32>
    %c0_18 = arith.constant 0 : index
    %c0_19 = arith.constant 0 : index
    %25 = vector.load %arg8[%c0_18, %c0_19] : memref<1x1xf32, #tpu.memory_space<vmem>>, vector<1x1xf32>
    %26 = vector.broadcast %25 : vector<1x1xf32> to vector<16x128xf32>
    %27 = arith.mulf %22, %26 : vector<16x128xf32>
    %28 = arith.select %24, %22, %27 : vector<16x128xi1>, vector<16x128xf32>
    %29 = arith.truncf %28 : vector<16x128xf32> to vector<16x128xbf16>
    %c0_20 = arith.constant 0 : index
    %c0_21 = arith.constant 0 : index
    %30 = vector.load %arg9[%c0_20, %c0_21] : memref<16x128xbf16, #tpu.memory_space<vmem>>, vector<16x128xbf16>
    tpu.vector_store %arg9[%c0_20, %c0_21], %29 {strides = array<i32>} : memref<16x128xbf16, #tpu.memory_space<vmem>>, vector<16x128xbf16>,
    return
  }
  func.func @transform_0(%arg0: i32) -> (i32, i32) {
    %c0_i32 = arith.constant 0 : i32
    %c0_i32_0 = arith.constant 0 : i32
    return %arg0, %c0_i32 : i32, i32
  }
  func.func @transform_1(%arg0: i32) -> (i32, i32) {
    %c0_i32 = arith.constant 0 : i32
    %c0_i32_0 = arith.constant 0 : i32
    %c0_i32_1 = arith.constant 0 : i32
    return %c0_i32, %c0_i32_0 : i32, i32
  }
  func.func @transform_2(%arg0: i32) -> (i32, i32) {
    %c0_i32 = arith.constant 0 : i32
    %c0_i32_0 = arith.constant 0 : i32
    %c0_i32_1 = arith.constant 0 : i32
    return %c0_i32, %c0_i32_0 : i32, i32
  }
  func.func @transform_3(%arg0: i32) -> (i32, i32) {
    %c0_i32 = arith.constant 0 : i32
    %c0_i32_0 = arith.constant 0 : i32
    %c0_i32_1 = arith.constant 0 : i32
    return %c0_i32, %c0_i32_0 : i32, i32
  }
  func.func @transform_4(%arg0: i32) -> (i32, i32) {
    %c0_i32 = arith.constant 0 : i32
    %c0_i32_0 = arith.constant 0 : i32
    %c0_i32_1 = arith.constant 0 : i32
    return %c0_i32, %c0_i32_0 : i32, i32
  }
  func.func @transform_5(%arg0: i32) -> (i32, i32) {
    %c0_i32 = arith.constant 0 : i32
    %c0_i32_0 = arith.constant 0 : i32
    %c0_i32_1 = arith.constant 0 : i32
    return %c0_i32, %c0_i32_0 : i32, i32
  }
  func.func @transform_6(%arg0: i32) -> (i32, i32) {
    %c0_i32 = arith.constant 0 : i32
    %c0_i32_0 = arith.constant 0 : i32
    %c0_i32_1 = arith.constant 0 : i32
    return %c0_i32, %c0_i32_0 : i32, i32
  }
  func.func @transform_7(%arg0: i32) -> (i32, i32) {
    %c0_i32 = arith.constant 0 : i32
    %c0_i32_0 = arith.constant 0 : i32
    %c0_i32_1 = arith.constant 0 : i32
    return %c0_i32, %c0_i32_0 : i32, i32
  }
  func.func @transform_8(%arg0: i32) -> (i32, i32) {
    %c0_i32 = arith.constant 0 : i32
    %c0_i32_0 = arith.constant 0 : i32
    return %c0_i32, %arg0 : i32, i32
  }
}

</mosaic_0001>

<bundles_post_ra>
// kernel: netblock_forward.1
= control target key start
LH: loop header
LB: loop body
LE: loop exit
PB: predicated region body
PF: predicated region fallthrough
CT: control target
= control target key end

     0   :  { %s1364_s0 = inlined_call_operand.vmem [shape: f32[300,32], index: 0, kind: input, shape index: {}]   ;;  %s1365_s1 = inlined_call_operand.vmem [shape: bf16[64,32], index: 1, kind: input, shape index: {}]   ;;  %s1366_s2 = inlined_call_operand.vmem [shape: f32[64,1], index: 2, kind: input, shape index: {}]   ;;  %s1367_s3 = inlined_call_operand.vmem [shape: bf16[48,64], index: 3, kind: input, shape index: {}]   ;;  %s1368_s4 = inlined_call_operand.vmem [shape: f32[48,1], index: 4, kind: input, shape index: {}]   ;;  %s1369_s5 = inlined_call_operand.vmem [shape: bf16[16,48], index: 5, kind: input, shape index: {}]   ;;  %s1370_s6 = inlined_call_operand.vmem [shape: f32[16,1], index: 6, kind: input, shape index: {}]   ;;  %s1371_s7 = inlined_call_operand.<no memory space> [shape: f32[1,1], index: 7, kind: input, shape index: {}]   ;;  %s1372_s8 = inlined_call_operand.hbm [shape: bf16[16,300], index: 8, kind: output, shape index: {}]  }
   0x1   :  { %v13_v0 = vstv %s1371_s7 }
   0x2   :  { %14 = vst [vmem:[#allocation2] sm:$0x1] %v13_v0 }
   0x3   :  { %15 = vsyncpa [#allocation4], 0 }
   0x4   :  { %17 = vsyncpa [#allocation4 + $0x1], 0  ;;  %s1137_s29 = smov 0   ;;  %s1139_s30 = smov 0  }
   0x5   :  { %s1141_s9 = smov 0   ;;  %s1143_s10 = smov 0  }
   0x6 LB: > { %s1158_s7 = sadd.s32 4294967295, %s1080_s10   ;;  %s841_s11 = sadd.s32 4294967294, %s1080_s10   ;;  %s1080_s10 = sphi %s1143_s10, %s1378_s10   ;;  %s1076_s9 = sphi %s1141_s9, %s1377_s9   ;;  %s1072_s30 = sphi %s1139_s30, %s1376_s30   ;;  %s1068_s29 = sphi %s1137_s29, %s1375_s29  }
   0x7   : > { %s1162_s12 = sadd.s32 1, %s1080_s10   ;;  %s203_s13 = sadd.s32 1, %s1076_s9 }
   0x8   : > { %s200_s14 = ssub.s32 %s1080_s10, %s1162_s12  ;;  %p213_p0 = scmp.ne.s32.totalorder %s1076_s9, %s1072_s30 }
   0x9   : > { %p201_p1 = scmp.eq.s32.totalorder %s200_s14, 0  ;;  %p214_p2 = scmp.eq.s32.totalorder %s1158_s7, 2 }
   0xa   : > { %p219_p3 = scmp.ne.s32.totalorder %s1072_s30, %s1068_s29  ;;  %p220_p4 = scmp.eq.s32.totalorder %s841_s11, 2 }
   0xb   : > { %s1173_s15 = scalar_select %p201_p1, %s1076_s9, %s203_s13  }
   0xc   : > { %p1175_p5 = por %p214_p2, %p213_p0  ;;  %p1179_p6 = por %p220_p4, %p219_p3 }
   0xd   : > { %p844_p7 = scmp.ge.s32.totalorder %s1080_s10, 1  ;;  %p276_p8 = scmp.lt.s32.totalorder %s1080_s10, 4 }
   0xf   : > { %p277_p9 = pnand %p844_p7, %p276_p8 }
  0x10   : > { %s846_s18 = sshll.u32 (!%p277_p9), %s1158_s7, 4  ;;  %v1010_v1 = vld [vmem:[%s1365_s1] sm:$0xff] (!%p277_p9)   ;;  %vm429_vm0 = vcmask (!%p277_p9), 261120   ;;  %v1082_v2 = vmov (!%p277_p9), 0   ;;  %v363_v4 = vld [vmem:[%s1366_s2 + $0x10] sm:$0xff] (!%p277_p9)  ;;  %v362_v5 = vld [vmem:[%s1366_s2 + $0x8] sm:$0xff] (!%p277_p9) }
  0x11   : > { %280 = sbr.rel (%p277_p9) target bundleno = 806 (0x326), region = 52  ;;  %p319_p10 = scmp.lt.s32.totalorder (!%p277_p9), %s846_s18, 37  ;;  %917 = vmatprep.mubr.msk.bf16.mxu0 (!%p277_p9), %vm429_vm0, %v1010_v1  ;;  %1008 = vset.pattern.permute.xlu0 (!%p277_p9), %v1082_v2  ;;  %v361_v3 = vld [vmem:[%s1366_s2] sm:$0xff] (!%p277_p9)  ;;  %v364_v6 = vld [vmem:[%s1366_s2 + $0x18] sm:$0xff] (!%p277_p9)  ;;  %v366_v15 = vld [vmem:[%s1366_s2 + $0x28] sm:$0xff] (!%p277_p9)  ;;  %v1083_v55 = vmov (!%p277_p9), 0.0  }
  0x12   : > { %1009 = vset.pattern.permute.xlu1 (!%p277_p9), %v1082_v2  ;;  %371 = vperm.xlu0 (!%p277_p9), %1008, %v361_v3   ;;  %v365_v14 = vld [vmem:[%s1366_s2 + $0x20] sm:$0xff] (!%p277_p9)  ;;  %v367_v18 = vld [vmem:[%s1366_s2 + $0x30] sm:$0xff] (!%p277_p9)  ;;  %v368_v20 = vld [vmem:[%s1366_s2 + $0x38] sm:$0xff] (!%p277_p9)  ;;  %vm1084_vm1 = vmmov (!%p277_p9), 0   ;;  %vm600_vm2 = vcmask (!%p277_p9), 523264   ;;  %vm695_vm3 = vcmask (!%p277_p9), 392192  }
  0x13   : > { %381 = vperm.xlu1 (!%p277_p9), %1009, %v363_v4   ;;  %v549_v22 = vld [vmem:[%s1368_s4] sm:$0xff] (!%p277_p9)  ;;  %v550_v23 = vld [vmem:[%s1368_s4 + $0x8] sm:$0xff] (!%p277_p9)  ;;  %v551_v26 = vld [vmem:[%s1368_s4 + $0x10] sm:$0xff] (!%p277_p9)  ;;  %925 = vmatprep.subr.bf16.mxu1 (!%p277_p9), %v1083_v55  ;;  %s311_s14 = sand.u32 (!%p277_p9), 1, %s1072_s30  }
  0x14   : > { %v552_v27 = vld [vmem:[%s1368_s4 + $0x18] sm:$0xff] (!%p277_p9)  ;;  %v553_v30 = vld [vmem:[%s1368_s4 + $0x20] sm:$0xff] (!%p277_p9)  ;;  %v554_v31 = vld [vmem:[%s1368_s4 + $0x28] sm:$0xff] (!%p277_p9)  ;;  %933 = vmatprep.mubr.msk.bf16.mxu1 (!%p277_p9), %vm1084_vm1, %v1083_v55  ;;  %s1323_s24 = scalar_lea.sflag (!%p277_p9), [#allocation4], %s311_s14 }
  0x15   : > { %v678_v34 = vld [vmem:[%s1370_s6] sm:$0xff] (!%p277_p9)  ;;  %v679_v35 = vld [vmem:[%s1370_s6 + $0x8] sm:$0xff] (!%p277_p9)  ;;  %v1012_v53 = vld [vmem:[%s1365_s1 + $0x10] sm:$0xff] (!%p277_p9)  }
  0x16   : > { %376 = vperm.xlu0 (!%p277_p9), %1008, %v362_v5   ;;  %v864_v38 = vld [vmem:[#allocation2] ss:$0 sm:$0xff] (!%p277_p9)  ;;  %v1011_v52 = vld [vmem:[%s1365_s1 + $0x8] sm:$0xff] (!%p277_p9)   ;;  %v1013_v54 = vld [vmem:[%s1365_s1 + $0x18] sm:$0xff] (!%p277_p9)  }
  0x17   : > { %386 = vperm.xlu1 (!%p277_p9), %1009, %v364_v6  }
  0x18   : > { %s1380_s18 = smov (!%p319_p10, %s846_s18), 37 }
  0x19   : > { %s847_s23 = sshll.u32 %s1380_s18, 3  ;;  %s845_s18 = sshll.u32 %s311_s14, 3 }
  0x1a   : > { %s1199_s28 = scalar_lea.vmem %s1364_s0, %s847_s23  ;;  %391 = vperm.xlu0 %1008, %v365_v14   ;;  %s313_s19 = scalar_lea.vmem [#allocation3], %s845_s18 }
  0x1b   : > { %v329_v7 = vld [vmem:[%s1199_s28] sm:$0xff]  ;;  %v330_v8 = vld [vmem:[%s1199_s28 + $0x8] sm:$0xff]  ;;  %v331_v9 = vld [vmem:[%s1199_s28 + $0x10] sm:$0xff]  ;;  %396 = vperm.xlu1 %1009, %v366_v15   ;;  %s779_s20 = sshll.u32 %s313_s19, 4  ;;  %s1316_s20 = int_to_ptr.vmem [resolvable:$true] %s779_s20 }
  0x1c   : > { %v345_v10 = vpack.c.bf16 %v330_v8, %v329_v7  ;;  %v332_v11 = vld [vmem:[%s1199_s28 + $0x18] sm:$0xff]  ;;  %v333_v16 = vld [vmem:[%s1199_s28 + $0x20] sm:$0xff]  ;;  %v334_v17 = vld [vmem:[%s1199_s28 + $0x28] sm:$0xff]  ;;  %s1018_s25 = scalar_lea.vmem %s1316_s20, 128 }
  0x1d   : > { %v346_v12 = vpack.c.bf16 %v332_v11, %v331_v9  ;;  %v347_v21 = vpack.c.bf16 %v334_v17, %v333_v16  ;;  %v335_v24 = vld [vmem:[%s1199_s28 + $0x30] sm:$0xff]  ;;  %v336_v25 = vld [vmem:[%s1199_s28 + $0x38] sm:$0xff]  ;;  %v337_v32 = vld [vmem:[%s1199_s28 + $0x40] sm:$0xff]  ;;  %p1019_p11 = scmp.ne.s32.totalorder %s1316_s20, %s1018_s25 }
  0x1e   : > { %955 = vmatprep.subr.msk.bf16.mxu0 %vm429_vm0, %v345_v10  ;;  %v443_v13 = vsel %vm429_vm0, %v345_v10, 0  ;;  %401 = vperm.xlu0 %1008, %v367_v18   ;;  %v348_v29 = vpack.c.bf16 %v336_v25, %v335_v24  ;;  %v338_v33 = vld [vmem:[%s1199_s28 + $0x48] sm:$0xff]  ;;  %v339_v39 = vld [vmem:[%s1199_s28 + $0x50] sm:$0xff]  ;;  %v340_v40 = vld [vmem:[%s1199_s28 + $0x58] sm:$0xff] }
  0x1f   : > { %902 = vmatpush3.bf16.xpose.msra.mxu0 %v443_v13  ;;  %v446_v19 = vsel %vm429_vm0, %v346_v12, 0  ;;  %406 = vperm.xlu1 %1009, %v368_v20   ;;  %v449_v28 = vsel %vm429_vm0, %v347_v21, 0  ;;  %v349_v37 = vpack.c.bf16 %v338_v33, %v337_v32  ;;  %v350_v42 = vpack.c.bf16 %v340_v40, %v339_v39  ;;  %v341_v43 = vld [vmem:[%s1199_s28 + $0x60] sm:$0xff]  ;;  %v342_v44 = vld [vmem:[%s1199_s28 + $0x68] sm:$0xff]  ;;  %v343_v47 = vld [vmem:[%s1199_s28 + $0x70] sm:$0xff]  ;;  %p1020_p12 = pnand %p1019_p11, %p1175_p5 }
  0x20   : > { %956 = vmatprep.subr.msk.bf16.mxu0 %vm429_vm0, %v346_v12  ;;  %v452_v36 = vsel %vm429_vm0, %v348_v29, 0  ;;  %v351_v46 = vpack.c.bf16 %v342_v44, %v341_v43  ;;  %v344_v48 = vld [vmem:[%s1199_s28 + $0x78] sm:$0xff]  ;;  %s868_s28 = sshll.u32 %s1158_s7, 6  ;;  %s1085_s7 = smov [#allocation3]  }
  0x21   : > { %v455_v41 = vsel %vm429_vm0, %v349_v37, 0  ;;  %v458_v45 = vsel %vm429_vm0, %v350_v42, 0  ;;  %v352_v50 = vpack.c.bf16 %v344_v48, %v343_v47  ;;  %s1321_s23 = scalar_lea.hbm %s1372_s8, %s868_s28  ;;  %p1021_p13 = pneg %p1020_p12 }
  0x22   : > { %557 = vperm.xlu0 %1008, %v549_v22   ;;  %v461_v49 = vsel %vm429_vm0, %v351_v46, 0  ;;  %s1022_s26 = sshll.u32 %s1085_s7, 4  ;;  %s1023_s26 = int_to_ptr.vmem [resolvable:$false] %s1022_s26 }
  0x23   : > { %562 = vperm.xlu1 %1009, %v550_v23   ;;  %v464_v51 = vsel %vm429_vm0, %v352_v50, 0  ;;  %s1024_s27 = scalar_lea.vmem %s1023_s26, 256  ;;  %p1025_p0 = scmp.lt.s32.totalorder %s1316_s20, %s1023_s26 }
  0x24   : > { %p1026_p1 = scmp.lt.s32.totalorder %s1024_s27, %s1018_s25 }
  0x26   : > { %567 = vperm.xlu0 %1008, %v551_v26   ;;  %p1027_p2 = por %p1026_p1, %p1025_p0 }
  0x27   : > { %904 = vmatpush3.bf16.xpose.msra.mxu0 %v446_v19  ;;  %572 = vperm.xlu1 %1009, %v552_v27  }
  0x28   : > { %957 = vmatprep.subr.msk.bf16.mxu0 %vm429_vm0, %v347_v21  ;;  %p1028_p3 = pnand %p1027_p2, %p1021_p13 }
  0x2a   : > { %577 = vperm.xlu0 %1008, %v553_v30   ;;  %v1016_v30 = vld [vmem:[%s1367_s3 + $0x10] sm:$0xff]  }
  0x2b   : > { %582 = vperm.xlu1 %1009, %v554_v31  }
  0x2e   : > { %682 = vperm.xlu0 %1008, %v678_v34  }
  0x2f   : > { %906 = vmatpush3.bf16.xpose.msra.mxu0 %v449_v28  ;;  %687 = vperm.xlu1 %1009, %v679_v35   ;;  %v1014_v28 = vld [vmem:[%s1367_s3] sm:$0xff]  }
  0x30   : > { %958 = vmatprep.subr.msk.bf16.mxu0 %vm429_vm0, %v348_v29  ;;  %v1015_v29 = vld [vmem:[%s1367_s3 + $0x8] sm:$0xff]  }
  0x32   : > { %749 = vperm.xlu0 %1008, %v864_v38  }
  0x37   : > { %908 = vmatpush3.bf16.xpose.msra.mxu0 %v452_v36 }
  0x38   : > { %959 = vmatprep.subr.msk.bf16.mxu0 %vm429_vm0, %v349_v37 }
  0x3f   : > { %910 = vmatpush3.bf16.xpose.msra.mxu0 %v455_v41 }
  0x40   : > { %960 = vmatprep.subr.msk.bf16.mxu0 %vm429_vm0, %v350_v42 }
  0x47   : > { %912 = vmatpush3.bf16.xpose.msra.mxu0 %v458_v45 }
  0x48   : > { %961 = vmatprep.subr.msk.bf16.mxu0 %vm429_vm0, %v351_v46 }
  0x4f   : > { %914 = vmatpush3.bf16.xpose.msra.mxu0 %v461_v49 }
  0x50   : > { %962 = vmatprep.subr.msk.bf16.mxu0 %vm429_vm0, %v352_v50 }
  0x57   : > { %916 = vmatpush3.bf16.xpose.msra.mxu0 %v464_v51 }
  0x5e   : > { %918 = vmatmul.mubr.msk.bf16.vlgmr.msra.gmra.mrb[0].mxu0 %vm429_vm0, %v1011_v52 }
  0x5f   : > { %921 = vmatprep.mubr.msk.bf16.mxu0 %vm429_vm0, %v1012_v53 }
  0x66   : > { %922 = vmatmul.mubr.msk.bf16.gmra.mrb[4].mxu0 %vm429_vm0, %v1013_v54 }
  0x91   : > { %v372_v56 = vpop.permute.xlu0 %371 }
  0x92   : > { %v382_v57 = vpop.permute.xlu1 %381 }
  0x95   : > { %v377_v58 = vpop.permute.xlu0 %376 }
  0x96   : > { %v387_v59 = vpop.permute.xlu1 %386 }
  0x99   : > { %v392_v63 = vpop.permute.xlu0 %391 }
  0x9a   : > { %v397_v4 = vpop.permute.xlu1 %396 }
  0x9d   : > { %v402_v11 = vpop.permute.xlu0 %401 }
  0x9e   : > { %v407_v16 = vpop.permute.xlu1 %406 }
  0xa1   : > { %v558_v31 = vpop.permute.xlu0 %557 }
  0xa2   : > { %v563_v35 = vpop.permute.xlu1 %562 }
  0xa5   : > { %v568_v42 = vpop.permute.xlu0 %567 }
  0xa6   : > { %v573_v46 = vpop.permute.xlu1 %572 }
  0xa9   : > { %v578_v53 = vpop.permute.xlu0 %577 }
 0x131   : > { %v919_v60 = vpop.f32.mrb[0].mxu0 }
 0x132   : > { %v509_v61 = vadd.f32 %v919_v60, %v382_v57  ;;  %v500_v62 = vpop.f32.mrb[1].mxu0 }
 0x133   : > { %v501_v0 = vadd.f32 %v500_v62, %v372_v56  ;;  %v920_v1 = vpop.f32.mrb[2].mxu0 }
 0x134   : > { %v512_v2 = vadd.f32 %v920_v1, %v387_v59  ;;  %v503_v3 = vpop.f32.mrb[3].mxu0  ;;  %v533_v6 = vmax.f32 %v509_v61, 0.0  ;;  %v1017_v1 = vld [vmem:[%s1369_s5] sm:$0xff]  }
 0x135   : > { %v504_v5 = vadd.f32 %v503_v3, %v377_v58  ;;  %v531_v8 = vmax.f32 %v501_v0, 0.0  ;;  %v583_v58 = vpop.permute.xlu1 %582 }
 0x136   : > { %v534_v7 = vmax.f32 %v512_v2, 0.0  ;;  %v683_v2 = vpop.permute.xlu0 %682 }
 0x137   : > { %v532_v9 = vmax.f32 %v504_v5, 0.0 }
 0x138   : > { %v540_v10 = vpack.c.bf16 %v534_v7, %v533_v6 }
 0x139   : > { %v923_v12 = vpop.f32.mrb[4].mxu0  ;;  %v539_v13 = vpack.c.bf16 %v532_v9, %v531_v8 }
 0x13a   : > { %v525_v14 = vadd.f32 %v923_v12, %v402_v11  ;;  %v516_v15 = vpop.f32.mrb[5].mxu0  ;;  %v750_v6 = vpop.permute.xlu0 %749 }
 0x13b   : > { %v517_v17 = vadd.f32 %v516_v15, %v392_v63  ;;  %v924_v18 = vpop.f32.mrb[6].mxu0  ;;  %926 = vmatpush3.bf16.msra.mxu1 %v539_v13 }
 0x13c   : > { %v528_v19 = vadd.f32 %v924_v18, %v407_v16  ;;  %v519_v20 = vpop.f32.mrb[7].mxu0  ;;  %927 = vmatprep.subr.bf16.mxu1 %v1083_v55  ;;  %v537_v22 = vmax.f32 %v525_v14, 0.0 }
 0x13d   : > { %v520_v21 = vadd.f32 %v519_v20, %v397_v4  ;;  %v535_v24 = vmax.f32 %v517_v17, 0.0  ;;  %v688_v4 = vpop.permute.xlu1 %687 }
 0x13e   : > { %v538_v23 = vmax.f32 %v528_v19, 0.0 }
 0x13f   : > { %v536_v25 = vmax.f32 %v520_v21, 0.0  ;;  %928 = vmatpush3.bf16.msra.mxu1 %v540_v10 }
 0x140   : > { %v542_v26 = vpack.c.bf16 %v538_v23, %v537_v22  ;;  %929 = vmatprep.subr.bf16.mxu1 %v1083_v55 }
 0x141   : > { %v541_v27 = vpack.c.bf16 %v536_v25, %v535_v24 }
 0x143   : > { %930 = vmatpush3.bf16.msra.mxu1 %v541_v27 }
 0x144   : > { %931 = vmatprep.subr.bf16.mxu1 %v1083_v55 }
 0x147   : > { %932 = vmatpush3.bf16.msra.mxu1 %v542_v26 }
 0x148   : > { %945 = vmatprep.subr.bf16.mxu1 %v1083_v55 }
 0x14a   : > { %934 = vmatmul.mubr.msk.bf16.vlgmr.msra.gmra.mrb[0].mxu1 %vm600_vm2, %v1014_v28 }
 0x14b   : > { %937 = vmatprep.mubr.msk.bf16.mxu1 %vm1084_vm1, %v1083_v55 }
 0x152   : > { %938 = vmatmul.mubr.msk.bf16.gmra.mrb[4].mxu1 %vm600_vm2, %v1015_v29 }
 0x153   : > { %941 = vmatprep.mubr.msk.bf16.mxu1 %vm1084_vm1, %v1083_v55 }
 0x15a   : > { %942 = vmatmul.mubr.msk.bf16.gmra.mrb[8].mxu1 %vm600_vm2, %v1016_v30 }
 0x15b   : > { %951 = vmatprep.mubr.msk.bf16.mxu1 %vm1084_vm1, %v1083_v55 }
 0x21d   : > { %v644_v32 = vpop.f32.mrb[0].mxu1 }
 0x21e   : > { %v645_v33 = vadd.f32 %v644_v32, %v558_v31  ;;  %v935_v34 = vpop.f32.mrb[1].mxu1 }
 0x21f   : > { %v647_v36 = vpop.f32.mrb[2].mxu1 }
 0x220   : > { %v648_v37 = vadd.f32 %v647_v36, %v563_v35  ;;  %v936_v38 = vpop.f32.mrb[3].mxu1  ;;  %v667_v39 = vmax.f32 %v645_v33, 0.0 }
 0x222   : > { %v668_v40 = vmax.f32 %v648_v37, 0.0 }
 0x224   : > { %v673_v41 = vpack.c.bf16 %v668_v40, %v667_v39 }
 0x225   : > { %v652_v43 = vpop.f32.mrb[4].mxu1 }
 0x226   : > { %v653_v44 = vadd.f32 %v652_v43, %v568_v42  ;;  %v939_v45 = vpop.f32.mrb[5].mxu1  ;;  %946 = vmatpush3.bf16.msra.mxu1 %v673_v41 }
 0x227   : > { %v655_v47 = vpop.f32.mrb[6].mxu1  ;;  %947 = vmatprep.subr.bf16.mxu1 %v1083_v55 }
 0x228   : > { %v656_v48 = vadd.f32 %v655_v47, %v573_v46  ;;  %v940_v49 = vpop.f32.mrb[7].mxu1  ;;  %v669_v50 = vmax.f32 %v653_v44, 0.0 }
 0x22a   : > { %v670_v51 = vmax.f32 %v656_v48, 0.0 }
 0x22c   : > { %v674_v52 = vpack.c.bf16 %v670_v51, %v669_v50 }
 0x22d   : > { %v660_v54 = vpop.f32.mrb[8].mxu1 }
 0x22e   : > { %v661_v56 = vadd.f32 %v660_v54, %v578_v53  ;;  %v943_v57 = vpop.f32.mrb[9].mxu1  ;;  %948 = vmatpush3.bf16.msra.mxu1 %v674_v52 }
 0x22f   : > { %v663_v59 = vpop.f32.mrb[10].mxu1  ;;  %949 = vmatprep.subr.bf16.mxu1 %v1083_v55 }
 0x230   : > { %v664_v60 = vadd.f32 %v663_v59, %v583_v58  ;;  %v944_v61 = vpop.f32.mrb[11].mxu1  ;;  %v671_v62 = vmax.f32 %v661_v56, 0.0 }
 0x232   : > { %v672_v63 = vmax.f32 %v664_v60, 0.0 }
 0x234   : > { %v675_v0 = vpack.c.bf16 %v672_v63, %v671_v62 }
 0x236   : > { %950 = vmatpush3.bf16.msra.mxu1 %v675_v0 }
 0x239   : > { %952 = vmatmul.mubr.msk.bf16.vlgmr.msra.gmra.mrb[12].mxu1 %vm695_vm3, %v1017_v1 }
 0x30c   : > { %v733_v3 = vpop.f32.mrb[12].mxu1 }
 0x30d   : > { %v734_v5 = vadd.f32 %v733_v3, %v683_v2  ;;  %v953_v55 = vpop.f32.mrb[13].mxu1 }
 0x30e   : > { %v736_v7 = vpop.f32.mrb[14].mxu1 }
 0x30f   : > { %v752_v8 = vmul.f32 %v750_v6, %v734_v5  ;;  %v737_v9 = vadd.f32 %v736_v7, %v688_v4  ;;  %v954_v10 = vpop.f32.mrb[15].mxu1  ;;  %vm740_vm4 = vcmp.ge.f32.partialorder %v734_v5, 0.0 }
 0x311   : > { %vm741_vm5 = vcmp.ge.f32.partialorder %v737_v9, 0.0  ;;  %v753_v11 = vmul.f32 %v750_v6, %v737_v9  ;;  %v754_v12 = vsel %vm740_vm4, %v734_v5, %v752_v8 }
 0x313   : > { %v755_v13 = vsel %vm741_vm5, %v737_v9, %v753_v11 }
 0x314   : > { %v876_v14 = vpack.c.bf16 %v755_v13, %v754_v12 }
 0x316   : > { %877 = vst [vmem:[%s313_s19] sm:$0xff] %v876_v14  }
 0x317   : > { %1031 = shalt.err (!%p1028_p3)
}
 0x318   : > { %s1032_s11 = scalar_lea.hbm %s1321_s23, 128  ;;  %s1036_s18 = scalar_lea.hbm %s1372_s8, 384 }
 0x319   : > { %p1033_p4 = scmp.ne.s32.totalorder %s1321_s23, %s1032_s11  ;;  %p1037_p9 = scmp.lt.u32.totalorder %s1321_s23, %s1372_s8 }
 0x31a   : > { %p1038_p10 = scmp.lt.u32.totalorder %s1036_s18, %s1032_s11  ;;  %p1040_p12 = scmp.lt.u32.totalorder %s1032_s11, %s1321_s23 }
 0x31b   : > { %p1034_p7 = pnand %p1033_p4, %p1175_p5 }
 0x31c   : > { %p1039_p11 = por %p1038_p10, %p1037_p9 }
 0x31d   : > { %p1035_p8 = pneg %p1034_p7 }
 0x31e   : > { %p1041_p13 = por %p1040_p12, %p1039_p11 }
 0x320   : > { %p1042_p0 = pnand %p1041_p13, %p1035_p8 }
 0x322   : > { %1045 = shalt.err (!%p1042_p0)
}
 0x323   : > { %s1086_s21 = smov 64   ;;  %s1087_s22 = smov 192  }
 0x324   : > { %s1088_s25 = smov 4  }
 0x325   : > { %963 = dma.vmem_to_hbm [thread:$0]  (%p1175_p5), %s1316_s20, 128, %s1321_s23, %s1323_s24, %s1086_s21, %s1087_s22, %s1088_s25  }
 0x326 PF: > { %p969_p1 = scmp.ge.s32.totalorder %s1080_s10, 2  ;;  %s794_s7 = sand.u32 1, %s1068_s29  }
 0x327   : > { %s795_s26 = scalar_lea.sflag [#allocation4], %s794_s7 }
 0x328   : > { %p966_p2 = pnand %p969_p1, %p1179_p6 }
 0x32a   : > { %1063 = dma.done.wait (!%p966_p2), %s795_s26, 128  }
 0x32b   : > { %1065 = vsyncadd (!%p966_p2), %s795_s26, 4294967168  ;;  %p20_p3 = scmp.ge.s32.totalorder %s1162_s12, 5   ;;  %s1375_s29 = smov %s1072_s30 }
 0x32c   : > { %s1376_s30 = smov %s1076_s9  ;;  %s1377_s9 = smov %s1173_s15 }
 0x32d   : > { %s1378_s10 = smov %s1162_s12  ;;  %22 = sbr.rel (!%p20_p3) target bundleno = 6 (0x6), region = 87 }
 0x334   :  { %800 = vsyncpa [#allocation4], 1 }
 0x335   :  { %802 = vsyncpa [#allocation4 + $0x1], 1 }

</bundles_post_ra>
